<compile_context>
chip_gen: v7x
topology: tpu7x:2x2x1
jax: 0.10.0
libtpu: 0.0.40
codegen_flags: <defaults>
</compile_context>

<pallas_src>
from functools import partial

import jax
import jax.numpy as jnp
from jax.experimental import pallas as pl
from jax.experimental.pallas import tpu as pltpu

_LANE = 128     # f32 lane width of a vreg
_SUBLANE = 8    # f32 sublane count of a vreg


def _round_up(n, m):
    return ((n + m - 1) // m) * m


def _pad2d(a, rows, cols):
    """Zero-pad a 2-D array up to (rows, cols) without copying if already sized."""
    r, c = a.shape
    if r == rows and c == cols:
        return a
    return jnp.pad(a, ((0, rows - r), (0, cols - c)))


def mlp_kernel(x_ref,
               w0_ref, b0_ref,
               w1_ref, b1_ref,
               w2_ref, b2_ref,
               w3_ref, b3_ref,
               o_ref,
               *, compute_dtype):
    """All four matmuls + sigmoids fused; every operand VMEM-resident."""

    def matmul(a, w_ref):
        # Weights already arrive in `compute_dtype` (f32 or bf16); only the
        # activations need casting.  Accumulation is always f32.
        return jnp.dot(a.astype(compute_dtype), w_ref[...],
                       preferred_element_type=jnp.float32)

    h = matmul(x_ref[...], w0_ref) + b0_ref[...]
    h = jax.nn.sigmoid(h)                       # f32 on the EUP
    h = matmul(h, w1_ref) + b1_ref[...]
    h = jax.nn.sigmoid(h)
    h = matmul(h, w2_ref) + b2_ref[...]
    h = jax.nn.sigmoid(h)
    o_ref[...] = (matmul(h, w3_ref) + b3_ref[...]).astype(o_ref.dtype)


def mlp_forward(x, params, *, block_b=None, use_bf16=False):
    """x: (B, input).  params: list of (W (in,out), b (1,out)) for 4 layers."""
    B, in_dim = x.shape
    out_dim = params[-1][0].shape[1]
    w_dtype = jnp.bfloat16 if use_bf16 else jnp.float32

    # ---- lane-pad every feature dim to a multiple of 128 -------------------
    in_p = _round_up(in_dim, _LANE)
    padded = []
    for (w, b) in params:
        fi, fo = w.shape
        fi_p, fo_p = _round_up(fi, _LANE), _round_up(fo, _LANE)
        w_p = _pad2d(w.astype(jnp.float32), fi_p, fo_p).astype(w_dtype)
        b_p = _pad2d(b.astype(jnp.float32), 1, fo_p)
        padded.append((w_p, b_p))
    out_p = padded[-1][0].shape[1]

    # ---- batch tiling -------------------------------------------------------
    if block_b is None:
        # Small batch -> one grid step (no per-step pipeline overhead).
        # Large batch -> 512-row tiles so double-buffered x/out stay in VMEM.
        block_b = min(_round_up(B, _SUBLANE), 512)
    block_b = _round_up(block_b, _SUBLANE)
    n_steps = pl.cdiv(B, block_b)            # never drops trailing rows
    B_p = n_steps * block_b
    x_p = _pad2d(x.astype(jnp.float32), B_p, in_p)

    # ---- specs --------------------------------------------------------------
    # Weights/biases are full blocks with a constant index map (resident, one
    # DMA total).  Note: for very large hidden dims on v7x (64 MiB VMEM) this
    # replicate-all pattern would need K/N tiling with an "arbitrary" axis.
    in_specs = [pl.BlockSpec((block_b, in_p), lambda i: (i, 0))]
    flat = [x_p]
    for (w_p, b_p) in padded:
        in_specs.append(pl.BlockSpec(w_p.shape, lambda i: (0, 0)))
        in_specs.append(pl.BlockSpec(b_p.shape, lambda i: (0, 0)))
        flat.extend([w_p, b_p])

    # Advisory cost estimate so XLA schedules the custom call sensibly.
    wsize = 2 if use_bf16 else 4
    flops = int(sum(2 * B_p * w_p.shape[0] * w_p.shape[1] for w_p, _ in padded))
    transcendentals = int(B_p * sum(w_p.shape[1] for w_p, _ in padded[:-1]))
    bytes_accessed = int(4 * (x_p.size + B_p * out_p)
                         + sum(wsize * w_p.size + 4 * b_p.size
                               for w_p, b_p in padded))

    out_padded = pl.pallas_call(
        partial(mlp_kernel, compute_dtype=w_dtype),
        out_shape=jax.ShapeDtypeStruct((B_p, out_p), jnp.float32),
        grid=(n_steps,),
        in_specs=in_specs,
        out_specs=pl.BlockSpec((block_b, out_p), lambda i: (i, 0)),
        compiler_params=pltpu.CompilerParams(
            dimension_semantics=("parallel",),
            vmem_limit_bytes=64 * 1024 * 1024),
        cost_estimate=pl.CostEstimate(
            flops=flops,
            transcendentals=transcendentals,
            bytes_accessed=bytes_accessed),
    )(*flat)

    return out_padded[:B, :out_dim]


def xavier_uniform(key, fan_in, fan_out):
    # Matches torch.nn.init.xavier_uniform_ (gain=1), stored transposed.
    limit = (6.0 / (fan_in + fan_out)) ** 0.5
    return jax.random.uniform(key, (fan_in, fan_out), jnp.float32, -limit, limit)


def init_params(key, input_dim, hidden_dim, output_dim):
    dims = [(input_dim, hidden_dim),
            (hidden_dim, hidden_dim),
            (hidden_dim, hidden_dim),
            (hidden_dim, output_dim)]
    keys = jax.random.split(key, len(dims))
    params = []
    for k, (fi, fo) in zip(keys, dims):
        w = xavier_uniform(k, fi, fo)
        b = jnp.zeros((1, fo), jnp.float32)    # zeros_ bias init
        params.append((w, b))
    return params


def reference_forward(x, params):
    h = x
    for i, (w, b) in enumerate(params):
        h = h @ w + b
        if i < len(params) - 1:
            h = jax.nn.sigmoid(h)
    return h


if __name__ == "__main__":
    BATCH, INPUT, HIDDEN, OUTPUT = 16, 16, 32, 8

    key = jax.random.PRNGKey(0)
    x_key, p_key = jax.random.split(key)
    x = jax.random.normal(x_key, (BATCH, INPUT), jnp.float32)
    params = init_params(p_key, INPUT, HIDDEN, OUTPUT)
    ref = reference_forward(x, params)

    # f32 path: single grid step, lane-padded — exact vs reference.
    out = jax.block_until_ready(mlp_forward(x, params))
    assert out.shape == (BATCH, OUTPUT)
    assert jnp.allclose(out, ref, atol=1e-5, rtol=1e-5)

    # Non-divisible batch: pl.cdiv + row padding, no silent truncation.
    out_odd = jax.block_until_ready(mlp_forward(x[:13], params))
    assert out_odd.shape == (13, OUTPUT)
    assert jnp.allclose(out_odd, ref[:13], atol=1e-5, rtol=1e-5)

    # Multi-step batch grid (forces the pipelined path).
    x_big = jnp.tile(x, (4, 1))
    out_big = jax.block_until_ready(mlp_forward(x_big, params, block_b=16))
    assert out_big.shape == (4 * BATCH, OUTPUT)
    assert jnp.allclose(out_big, jnp.tile(ref, (4, 1)), atol=1e-5, rtol=1e-5)

    # bf16-operand MXU fast path (v6e/v7x); accumulation stays f32.
    out_bf16 = jax.block_until_ready(mlp_forward(x, params, use_bf16=True))
    assert jnp.allclose(out_bf16, ref, atol=5e-2, rtol=5e-2)

    print("KERNEL_OK")
</pallas_src>

<mosaic_0001>
module attributes {stable_mosaic.version = 11 : i64} {
  func.func @mlp_kernel(%arg0: i32, %arg1: memref<16x128xf32, #tpu.memory_space<vmem>>, %arg2: memref<128x128xf32, #tpu.memory_space<vmem>>, %arg3: memref<1x128xf32, #tpu.memory_space<vmem>>, %arg4: memref<128x128xf32, #tpu.memory_space<vmem>>, %arg5: memref<1x128xf32, #tpu.memory_space<vmem>>, %arg6: memref<128x128xf32, #tpu.memory_space<vmem>>, %arg7: memref<1x128xf32, #tpu.memory_space<vmem>>, %arg8: memref<128x128xf32, #tpu.memory_space<vmem>>, %arg9: memref<1x128xf32, #tpu.memory_space<vmem>>, %arg10: memref<16x128xf32, #tpu.memory_space<vmem>>) attributes {dimension_semantics = [#tpu.dimension_semantics<parallel>], iteration_bounds = array<i64: 1>, scalar_prefetch = 0 : i64, scratch_operands = 0 : i64, tpu.core_type = #tpu.core_type<tc>, window_params = [{transform_indices = @transform_0, window_bounds = array<i64: 16, 128>}, {pipeline_mode = #tpu.pipeline_mode<synchronous>, transform_indices = @transform_1, window_bounds = array<i64: 128, 128>}, {pipeline_mode = #tpu.pipeline_mode<synchronous>, transform_indices = @transform_2, window_bounds = array<i64: 1, 128>}, {pipeline_mode = #tpu.pipeline_mode<synchronous>, transform_indices = @transform_3, window_bounds = array<i64: 128, 128>}, {pipeline_mode = #tpu.pipeline_mode<synchronous>, transform_indices = @transform_4, window_bounds = array<i64: 1, 128>}, {pipeline_mode = #tpu.pipeline_mode<synchronous>, transform_indices = @transform_5, window_bounds = array<i64: 128, 128>}, {pipeline_mode = #tpu.pipeline_mode<synchronous>, transform_indices = @transform_6, window_bounds = array<i64: 1, 128>}, {pipeline_mode = #tpu.pipeline_mode<synchronous>, transform_indices = @transform_7, window_bounds = array<i64: 128, 128>}, {pipeline_mode = #tpu.pipeline_mode<synchronous>, transform_indices = @transform_8, window_bounds = array<i64: 1, 128>}, {transform_indices = @transform_9, window_bounds = array<i64: 16, 128>}]} {
    %c0 = arith.constant 0 : index
    %c0_0 = arith.constant 0 : index
    %0 = vector.load %arg1[%c0, %c0_0] : memref<16x128xf32, #tpu.memory_space<vmem>>, vector<16x128xf32>
    %c0_1 = arith.constant 0 : index
    %c0_2 = arith.constant 0 : index
    %1 = vector.load %arg2[%c0_1, %c0_2] : memref<128x128xf32, #tpu.memory_space<vmem>>, vector<128x128xf32>
    %cst = arith.constant dense<0.000000e+00> : vector<16x128xf32>
    %2 = tpu.matmul %0, %1, %cst {dimension_numbers = #tpu.dot_dimension_numbers<[1], [0], [0], [1], [0, 0, 1, 1], [], []>} : vector<16x128xf32>, vector<128x128xf32>, vector<16x128xf32> -> vector<16x128xf32>
    %c0_3 = arith.constant 0 : index
    %c0_4 = arith.constant 0 : index
    %3 = vector.load %arg3[%c0_3, %c0_4] : memref<1x128xf32, #tpu.memory_space<vmem>>, vector<1x128xf32>
    %4 = vector.broadcast %3 : vector<1x128xf32> to vector<16x128xf32>
    %5 = arith.addf %2, %4 : vector<16x128xf32>
    %6 = arith.negf %5 : vector<16x128xf32>
    %7 = math.exp %6 : vector<16x128xf32>
    %cst_5 = arith.constant 1.000000e+00 : f32
    %8 = vector.broadcast %cst_5 : f32 to vector<16x128xf32>
    %9 = arith.addf %8, %7 : vector<16x128xf32>
    %10 = arith.divf %8, %9 : vector<16x128xf32>
    %c0_6 = arith.constant 0 : index
    %c0_7 = arith.constant 0 : index
    %11 = vector.load %arg4[%c0_6, %c0_7] : memref<128x128xf32, #tpu.memory_space<vmem>>, vector<128x128xf32>
    %cst_8 = arith.constant dense<0.000000e+00> : vector<16x128xf32>
    %12 = tpu.matmul %10, %11, %cst_8 {dimension_numbers = #tpu.dot_dimension_numbers<[1], [0], [0], [1], [0, 0, 1, 1], [], []>} : vector<16x128xf32>, vector<128x128xf32>, vector<16x128xf32> -> vector<16x128xf32>
    %c0_9 = arith.constant 0 : index
    %c0_10 = arith.constant 0 : index
    %13 = vector.load %arg5[%c0_9, %c0_10] : memref<1x128xf32, #tpu.memory_space<vmem>>, vector<1x128xf32>
    %14 = vector.broadcast %13 : vector<1x128xf32> to vector<16x128xf32>
    %15 = arith.addf %12, %14 : vector<16x128xf32>
    %16 = arith.negf %15 : vector<16x128xf32>
    %17 = math.exp %16 : vector<16x128xf32>
    %cst_11 = arith.constant 1.000000e+00 : f32
    %18 = vector.broadcast %cst_11 : f32 to vector<16x128xf32>
    %19 = arith.addf %18, %17 : vector<16x128xf32>
    %20 = arith.divf %18, %19 : vector<16x128xf32>
    %c0_12 = arith.constant 0 : index
    %c0_13 = arith.constant 0 : index
    %21 = vector.load %arg6[%c0_12, %c0_13] : memref<128x128xf32, #tpu.memory_space<vmem>>, vector<128x128xf32>
    %cst_14 = arith.constant dense<0.000000e+00> : vector<16x128xf32>
    %22 = tpu.matmul %20, %21, %cst_14 {dimension_numbers = #tpu.dot_dimension_numbers<[1], [0], [0], [1], [0, 0, 1, 1], [], []>} : vector<16x128xf32>, vector<128x128xf32>, vector<16x128xf32> -> vector<16x128xf32>
    %c0_15 = arith.constant 0 : index
    %c0_16 = arith.constant 0 : index
    %23 = vector.load %arg7[%c0_15, %c0_16] : memref<1x128xf32, #tpu.memory_space<vmem>>, vector<1x128xf32>
    %24 = vector.broadcast %23 : vector<1x128xf32> to vector<16x128xf32>
    %25 = arith.addf %22, %24 : vector<16x128xf32>
    %26 = arith.negf %25 : vector<16x128xf32>
    %27 = math.exp %26 : vector<16x128xf32>
    %cst_17 = arith.constant 1.000000e+00 : f32
    %28 = vector.broadcast %cst_17 : f32 to vector<16x128xf32>
    %29 = arith.addf %28, %27 : vector<16x128xf32>
    %30 = arith.divf %28, %29 : vector<16x128xf32>
    %c0_18 = arith.constant 0 : index
    %c0_19 = arith.constant 0 : index
    %31 = vector.load %arg8[%c0_18, %c0_19] : memref<128x128xf32, #tpu.memory_space<vmem>>, vector<128x128xf32>
    %cst_20 = arith.constant dense<0.000000e+00> : vector<16x128xf32>
    %32 = tpu.matmul %30, %31, %cst_20 {dimension_numbers = #tpu.dot_dimension_numbers<[1], [0], [0], [1], [0, 0, 1, 1], [], []>} : vector<16x128xf32>, vector<128x128xf32>, vector<16x128xf32> -> vector<16x128xf32>
    %c0_21 = arith.constant 0 : index
    %c0_22 = arith.constant 0 : index
    %33 = vector.load %arg9[%c0_21, %c0_22] : memref<1x128xf32, #tpu.memory_space<vmem>>, vector<1x128xf32>
    %34 = vector.broadcast %33 : vector<1x128xf32> to vector<16x128xf32>
    %35 = arith.addf %32, %34 : vector<16x128xf32>
    %c0_23 = arith.constant 0 : index
    %c0_24 = arith.constant 0 : index
    %36 = vector.load %arg10[%c0_23, %c0_24] : memref<16x128xf32, #tpu.memory_space<vmem>>, vector<16x128xf32>
    tpu.vector_store %arg10[%c0_23, %c0_24], %35 {strides = array<i32>} : memref<16x128xf32, #tpu.memory_space<vmem>>, vector<16x128xf32>,
    return
  }
  func.func @transform_0(%arg0: i32) -> (i32, i32) {
    %c0_i32 = arith.constant 0 : i32
    %c0_i32_0 = arith.constant 0 : i32
    return %arg0, %c0_i32 : i32, i32
  }
  func.func @transform_1(%arg0: i32) -> (i32, i32) {
    %c0_i32 = arith.constant 0 : i32
    %c0_i32_0 = arith.constant 0 : i32
    %c0_i32_1 = arith.constant 0 : i32
    return %c0_i32, %c0_i32_0 : i32, i32
  }
  func.func @transform_2(%arg0: i32) -> (i32, i32) {
    %c0_i32 = arith.constant 0 : i32
    %c0_i32_0 = arith.constant 0 : i32
    %c0_i32_1 = arith.constant 0 : i32
    return %c0_i32, %c0_i32_0 : i32, i32
  }
  func.func @transform_3(%arg0: i32) -> (i32, i32) {
    %c0_i32 = arith.constant 0 : i32
    %c0_i32_0 = arith.constant 0 : i32
    %c0_i32_1 = arith.constant 0 : i32
    return %c0_i32, %c0_i32_0 : i32, i32
  }
  func.func @transform_4(%arg0: i32) -> (i32, i32) {
    %c0_i32 = arith.constant 0 : i32
    %c0_i32_0 = arith.constant 0 : i32
    %c0_i32_1 = arith.constant 0 : i32
    return %c0_i32, %c0_i32_0 : i32, i32
  }
  func.func @transform_5(%arg0: i32) -> (i32, i32) {
    %c0_i32 = arith.constant 0 : i32
    %c0_i32_0 = arith.constant 0 : i32
    %c0_i32_1 = arith.constant 0 : i32
    return %c0_i32, %c0_i32_0 : i32, i32
  }
  func.func @transform_6(%arg0: i32) -> (i32, i32) {
    %c0_i32 = arith.constant 0 : i32
    %c0_i32_0 = arith.constant 0 : i32
    %c0_i32_1 = arith.constant 0 : i32
    return %c0_i32, %c0_i32_0 : i32, i32
  }
  func.func @transform_7(%arg0: i32) -> (i32, i32) {
    %c0_i32 = arith.constant 0 : i32
    %c0_i32_0 = arith.constant 0 : i32
    %c0_i32_1 = arith.constant 0 : i32
    return %c0_i32, %c0_i32_0 : i32, i32
  }
  func.func @transform_8(%arg0: i32) -> (i32, i32) {
    %c0_i32 = arith.constant 0 : i32
    %c0_i32_0 = arith.constant 0 : i32
    %c0_i32_1 = arith.constant 0 : i32
    return %c0_i32, %c0_i32_0 : i32, i32
  }
  func.func @transform_9(%arg0: i32) -> (i32, i32) {
    %c0_i32 = arith.constant 0 : i32
    %c0_i32_0 = arith.constant 0 : i32
    return %arg0, %c0_i32 : i32, i32
  }
}

</mosaic_0001>

<bundles_post_ra>
// kernel: tpu_custom_call.1
= control target key start
LH: loop header
LB: loop body
LE: loop exit
PB: predicated region body
PF: predicated region fallthrough
CT: control target
= control target key end

     0   :  { %14 = vsyncpa [#allocation3], 0  ;;  %s1432_s0 = inlined_call_operand.hbm [shape: f32[16,128], index: 0, kind: input, shape index: {}]   ;;  %s1433_s1 = inlined_call_operand.hbm [shape: f32[128,128], index: 1, kind: input, shape index: {}]   ;;  %s1434_s2 = inlined_call_operand.hbm [shape: f32[1,128], index: 2, kind: input, shape index: {}]   ;;  %s1435_s3 = inlined_call_operand.hbm [shape: f32[128,128], index: 3, kind: input, shape index: {}]   ;;  %s1436_s4 = inlined_call_operand.hbm [shape: f32[1,128], index: 4, kind: input, shape index: {}]   ;;  %s1437_s5 = inlined_call_operand.hbm [shape: f32[128,128], index: 5, kind: input, shape index: {}]   ;;  %s1438_s6 = inlined_call_operand.hbm [shape: f32[1,128], index: 6, kind: input, shape index: {}]   ;;  %s1439_s7 = inlined_call_operand.hbm [shape: f32[128,128], index: 7, kind: input, shape index: {}]   ;;  %s1440_s8 = inlined_call_operand.hbm [shape: f32[1,128], index: 8, kind: input, shape index: {}]   ;;  %s1441_s9 = inlined_call_operand.hbm [shape: f32[16,128], index: 9, kind: output, shape index: {}]  }
   0x1   :  { %15 = vsyncpa [#allocation6], 0 }
   0x2   :  { %16 = vsyncpa [#allocation9], 0 }
   0x3   :  { %17 = vsyncpa [#allocation12], 0 }
   0x4   :  { %18 = vsyncpa [#allocation15], 0 }
   0x5   :  { %19 = vsyncpa [#allocation4], 0  ;;  %s1218_s30 = smov [#allocation5]   ;;  %s1219_s11 = smov [#allocation8]  }
   0x6   :  { %s37_s10 = sshll.u32 %s1218_s30, 4  ;;  %s59_s12 = sshll.u32 %s1219_s11, 4  ;;  %s38_s10 = int_to_ptr.vmem [resolvable:$true] %s37_s10  ;;  %s1280_s12 = int_to_ptr.vmem [resolvable:$true] %s59_s12 }
   0x7   :  { %s986_s15 = scalar_lea.hbm %s1433_s1, 2048 }
   0x8   :  { %p987_p0 = scmp.ne.s32.totalorder %s1433_s1, %s986_s15  ;;  %p990_p1 = scmp.lt.u32.totalorder %s986_s15, %s1433_s1 }
   0xa   :  { %p992_p2 = pnand %p990_p1, %p987_p0 }
   0xc   :  { %995 = shalt.err (!%p992_p2)
}
   0xd   :  { %s996_s20 = scalar_lea.vmem %s38_s10, 2048  ;;  %p1001_p4 = scmp.lt.s32.totalorder %s38_s10, %s38_s10 }
   0xe   :  { %p997_p3 = scmp.ne.s32.totalorder %s38_s10, %s996_s20  ;;  %p1002_p5 = scmp.lt.s32.totalorder %s996_s20, %s996_s20 }
  0x10   :  { %p1003_p6 = por %p1002_p5, %p1001_p4 }
  0x12   :  { %p1004_p7 = pnand %p1003_p6, %p997_p3 }
  0x14   :  { %1007 = shalt.err (!%p1004_p7)
}
  0x15   :  { %s1220_s21 = smov 128   ;;  %s1221_s22 = smov 8  }
  0x16   :  { %43 = dma.hbm_to_vmem [thread:$0]  %s1433_s1, 2048, %s38_s10, [#allocation6], %s1220_s21, %s1220_s21, %s1221_s22  }
  0x17   :  { %s1008_s27 = scalar_lea.hbm %s1435_s3, 2048 }
  0x18   :  { %p1009_p8 = scmp.ne.s32.totalorder %s1435_s3, %s1008_s27  ;;  %p1012_p9 = scmp.lt.u32.totalorder %s1008_s27, %s1435_s3 }
  0x1a   :  { %p1014_p10 = pnand %p1012_p9, %p1009_p8 }
  0x1c   :  { %1017 = shalt.err (!%p1014_p10)
}
  0x1d   :  { %s1018_s13 = scalar_lea.vmem %s1280_s12, 2048  ;;  %p1023_p12 = scmp.lt.s32.totalorder %s1280_s12, %s1280_s12 }
  0x1e   :  { %p1019_p11 = scmp.ne.s32.totalorder %s1280_s12, %s1018_s13  ;;  %p1024_p13 = scmp.lt.s32.totalorder %s1018_s13, %s1018_s13 }
  0x20   :  { %p1025_p0 = por %p1024_p13, %p1023_p12 }
  0x22   :  { %p1026_p1 = pnand %p1025_p0, %p1019_p11 }
  0x24   :  { %1029 = shalt.err (!%p1026_p1)
}
  0x25   :  { %65 = dma.hbm_to_vmem [thread:$0]  %s1435_s3, 2048, %s1280_s12, [#allocation9], %s1220_s21, %s1220_s21, %s1221_s22  }
  0x26   :  { %s1222_s14 = smov [#allocation11]   ;;  %s1223_s16 = smov [#allocation14]  }
  0x27   :  { %s81_s15 = sshll.u32 %s1222_s14, 4  ;;  %s103_s17 = sshll.u32 %s1223_s16, 4  ;;  %s82_s15 = int_to_ptr.vmem [resolvable:$true] %s81_s15  ;;  %s1317_s17 = int_to_ptr.vmem [resolvable:$true] %s103_s17 }
  0x28   :  { %s1030_s20 = scalar_lea.hbm %s1437_s5, 2048 }
  0x29   :  { %p1031_p2 = scmp.ne.s32.totalorder %s1437_s5, %s1030_s20  ;;  %p1034_p3 = scmp.lt.u32.totalorder %s1030_s20, %s1437_s5 }
  0x2b   :  { %p1036_p4 = pnand %p1034_p3, %p1031_p2 }
  0x2d   :  { %1039 = shalt.err (!%p1036_p4)
}
  0x2e   :  { %s1040_s3 = scalar_lea.vmem %s82_s15, 2048  ;;  %p1045_p6 = scmp.lt.s32.totalorder %s82_s15, %s82_s15 }
  0x2f   :  { %p1041_p5 = scmp.ne.s32.totalorder %s82_s15, %s1040_s3  ;;  %p1046_p7 = scmp.lt.s32.totalorder %s1040_s3, %s1040_s3 }
  0x31   :  { %p1047_p8 = por %p1046_p7, %p1045_p6 }
  0x33   :  { %p1048_p9 = pnand %p1047_p8, %p1041_p5 }
  0x35   :  { %1051 = shalt.err (!%p1048_p9)
}
  0x36   :  { %87 = dma.hbm_to_vmem [thread:$0]  %s1437_s5, 2048, %s82_s15, [#allocation12], %s1220_s21, %s1220_s21, %s1221_s22  }
  0x37   :  { %s1052_s30 = scalar_lea.hbm %s1439_s7, 2048 }
  0x38   :  { %p1053_p10 = scmp.ne.s32.totalorder %s1439_s7, %s1052_s30  ;;  %p1056_p11 = scmp.lt.u32.totalorder %s1052_s30, %s1439_s7 }
  0x3a   :  { %p1058_p12 = pnand %p1056_p11, %p1053_p10 }
  0x3c   :  { %1061 = shalt.err (!%p1058_p12)
}
  0x3d   :  { %s1062_s14 = scalar_lea.vmem %s1317_s17, 2048  ;;  %p1067_p0 = scmp.lt.s32.totalorder %s1317_s17, %s1317_s17 }
  0x3e   :  { %p1063_p13 = scmp.ne.s32.totalorder %s1317_s17, %s1062_s14  ;;  %p1068_p1 = scmp.lt.s32.totalorder %s1062_s14, %s1062_s14 }
  0x40   :  { %p1069_p2 = por %p1068_p1, %p1067_p0 }
  0x42   :  { %p1070_p3 = pnand %p1069_p2, %p1063_p13 }
  0x44   :  { %1073 = shalt.err (!%p1070_p3)
}
  0x45   :  { %109 = dma.hbm_to_vmem [thread:$0]  %s1439_s7, 2048, %s1317_s17, [#allocation15], %s1220_s21, %s1220_s21, %s1221_s22  }
  0x46   :  { %s1224_s16 = smov [#allocation2]   ;;  %s1225_s19 = smov [#allocation7]  }
  0x47   :  { %s25_s18 = sshll.u32 %s1224_s16, 4  ;;  %s50_s20 = sshll.u32 %s1225_s19, 4  ;;  %s26_s18 = int_to_ptr.vmem [resolvable:$true] %s25_s18  ;;  %s51_s20 = int_to_ptr.vmem [resolvable:$true] %s50_s20 }
  0x48   :  { %s1074_s25 = scalar_lea.hbm %s1432_s0, 256 }
  0x49   :  { %p1075_p4 = scmp.ne.s32.totalorder %s1432_s0, %s1074_s25  ;;  %p1078_p5 = scmp.lt.u32.totalorder %s1074_s25, %s1432_s0 }
  0x4b   :  { %p1080_p6 = pnand %p1078_p5, %p1075_p4 }
  0x4d   :  { %1083 = shalt.err (!%p1080_p6)
}
  0x4e   :  { %s1084_s7 = scalar_lea.vmem %s26_s18, 256  ;;  %p1089_p8 = scmp.lt.s32.totalorder %s26_s18, %s26_s18 }
  0x4f   :  { %p1085_p7 = scmp.ne.s32.totalorder %s26_s18, %s1084_s7  ;;  %p1090_p9 = scmp.lt.s32.totalorder %s1084_s7, %s1084_s7 }
  0x51   :  { %p1091_p10 = por %p1090_p9, %p1089_p8 }
  0x53   :  { %p1092_p11 = pnand %p1091_p10, %p1085_p7 }
  0x55   :  { %1095 = shalt.err (!%p1092_p11)
}
  0x56   :  { %31 = dma.hbm_to_vmem [thread:$0]  %s1432_s0, 256, %s26_s18, [#allocation3], %s1220_s21, %s1220_s21, %s1221_s22  }
  0x57   :  { %s1096_s11 = scalar_lea.hbm %s1434_s2, 16 }
  0x58   :  { %p1097_p12 = scmp.ne.s32.totalorder %s1434_s2, %s1096_s11  ;;  %p1100_p13 = scmp.lt.u32.totalorder %s1096_s11, %s1434_s2 }
  0x5a   :  { %p1102_p0 = pnand %p1100_p13, %p1097_p12 }
  0x5c   :  { %1105 = shalt.err (!%p1102_p0)
}
  0x5d   :  { %s1106_s5 = scalar_lea.vmem %s51_s20, 16  ;;  %s1110_s15 = scalar_lea.vmem %s51_s20, 32 }
  0x5e   :  { %p1107_p1 = scmp.ne.s32.totalorder %s51_s20, %s1106_s5  ;;  %p1111_p2 = scmp.lt.s32.totalorder %s51_s20, %s51_s20 }
  0x5f   :  { %p1112_p3 = scmp.lt.s32.totalorder %s1110_s15, %s1106_s5 }
  0x61   :  { %p1113_p4 = por %p1112_p3, %p1111_p2 }
  0x63   :  { %p1114_p5 = pnand %p1113_p4, %p1107_p1 }
  0x65   :  { %1117 = shalt.err (!%p1114_p5)
}
  0x66   :  { %53 = dma.hbm_to_vmem [thread:$0]  %s1434_s2, 16, %s51_s20, [#allocation6]  }
  0x67   :  { %s1226_s18 = smov [#allocation10]   ;;  %s1227_s23 = smov [#allocation13]  }
  0x68   :  { %s72_s19 = sshll.u32 %s1226_s18, 4  ;;  %s94_s24 = sshll.u32 %s1227_s23, 4  ;;  %s73_s19 = int_to_ptr.vmem [resolvable:$true] %s72_s19  ;;  %s95_s24 = int_to_ptr.vmem [resolvable:$true] %s94_s24 }
  0x69   :  { %s1118_s3 = scalar_lea.hbm %s1436_s4, 16 }
  0x6a   :  { %p1119_p6 = scmp.ne.s32.totalorder %s1436_s4, %s1118_s3  ;;  %p1122_p7 = scmp.lt.u32.totalorder %s1118_s3, %s1436_s4 }
  0x6c   :  { %p1124_p8 = pnand %p1122_p7, %p1119_p6 }
  0x6e   :  { %1127 = shalt.err (!%p1124_p8)
}
  0x6f   :  { %s1128_s2 = scalar_lea.vmem %s73_s19, 16  ;;  %s1132_s20 = scalar_lea.vmem %s73_s19, 32 }
  0x70   :  { %p1129_p9 = scmp.ne.s32.totalorder %s73_s19, %s1128_s2  ;;  %p1133_p10 = scmp.lt.s32.totalorder %s73_s19, %s73_s19 }
  0x71   :  { %p1134_p11 = scmp.lt.s32.totalorder %s1132_s20, %s1128_s2 }
  0x73   :  { %p1135_p12 = por %p1134_p11, %p1133_p10 }
  0x75   :  { %p1136_p13 = pnand %p1135_p12, %p1129_p9 }
  0x77   :  { %1139 = shalt.err (!%p1136_p13)
}
  0x78   :  { %75 = dma.hbm_to_vmem [thread:$0]  %s1436_s4, 16, %s73_s19, [#allocation9]  }
  0x79   :  { %s1140_s13 = scalar_lea.hbm %s1438_s6, 16 }
  0x7a   :  { %p1141_p0 = scmp.ne.s32.totalorder %s1438_s6, %s1140_s13  ;;  %p1144_p1 = scmp.lt.u32.totalorder %s1140_s13, %s1438_s6 }
  0x7c   :  { %p1146_p2 = pnand %p1144_p1, %p1141_p0 }
  0x7e   :  { %1149 = shalt.err (!%p1146_p2)
}
  0x7f   :  { %s1150_s15 = scalar_lea.vmem %s95_s24, 16  ;;  %s1154_s0 = scalar_lea.vmem %s95_s24, 32 }
  0x80   :  { %p1151_p3 = scmp.ne.s32.totalorder %s95_s24, %s1150_s15  ;;  %p1155_p4 = scmp.lt.s32.totalorder %s95_s24, %s95_s24 }
  0x81   :  { %p1156_p5 = scmp.lt.s32.totalorder %s1154_s0, %s1150_s15 }
  0x83   :  { %p1157_p6 = por %p1156_p5, %p1155_p4 }
  0x85   :  { %p1158_p7 = pnand %p1157_p6, %p1151_p3 }
  0x87   :  { %1161 = shalt.err (!%p1158_p7)
}
  0x88   :  { %97 = dma.hbm_to_vmem [thread:$0]  %s1438_s6, 16, %s95_s24, [#allocation12]  }
  0x89   :  { %s1228_s18 = smov [#allocation16]   ;;  %s1162_s26 = scalar_lea.hbm %s1440_s8, 16 }
  0x8a   :  { %s116_s19 = sshll.u32 %s1228_s18, 4  ;;  %p1163_p8 = scmp.ne.s32.totalorder %s1440_s8, %s1162_s26  ;;  %s117_s19 = int_to_ptr.vmem [resolvable:$true] %s116_s19 }
  0x8b   :  { %p1166_p9 = scmp.lt.u32.totalorder %s1162_s26, %s1440_s8 }
  0x8d   :  { %p1168_p10 = pnand %p1166_p9, %p1163_p8 }
  0x8f   :  { %1171 = shalt.err (!%p1168_p10)
}
  0x90   :  { %s1172_s17 = scalar_lea.vmem %s117_s19, 16  ;;  %s1176_s6 = scalar_lea.vmem %s117_s19, 32 }
  0x91   :  { %p1173_p11 = scmp.ne.s32.totalorder %s117_s19, %s1172_s17  ;;  %p1177_p12 = scmp.lt.s32.totalorder %s117_s19, %s117_s19 }
  0x92   :  { %p1178_p13 = scmp.lt.s32.totalorder %s1176_s6, %s1172_s17 }
  0x94   :  { %p1179_p0 = por %p1178_p13, %p1177_p12 }
  0x96   :  { %p1180_p1 = pnand %p1179_p0, %p1173_p11 }
  0x98   :  { %1183 = shalt.err (!%p1180_p1)
}
  0x99   :  { %119 = dma.hbm_to_vmem [thread:$0]  %s1440_s8, 16, %s117_s19, [#allocation15]  }
  0x9a   :  { %1206 = dma.done.wait [#allocation3], 256  }
  0x9b   :  { %1207 = vsyncadd [#allocation3], 4294967040 }
  0x9c   :  { %1208 = dma.done.wait [#allocation6], 2064  }
  0x9d   :  { %1209 = vsyncadd [#allocation6], 4294965232 }
  0x9e   :  { %1210 = dma.done.wait [#allocation9], 2064  }
  0x9f   :  { %1211 = vsyncadd [#allocation9], 4294965232 }
  0xa0   :  { %1212 = dma.done.wait [#allocation12], 2064  }
  0xa1   :  { %1213 = vsyncadd [#allocation12], 4294965232 }
  0xa2   :  { %1214 = dma.done.wait [#allocation15], 2064  }
  0xa3   :  { %1215 = vsyncadd [#allocation15], 4294965232  ;;  %v149_v0 = vld [vmem:[#allocation5] sm:$0xff]  ;;  %v150_v1 = vld [vmem:[#allocation5 + $0x8] sm:$0xff]  ;;  %s1229_s8 = smov [#allocation17]  }
  0xa4   :  { %v151_v2 = vld [vmem:[#allocation5 + $0x10] sm:$0xff]  ;;  %v822_v3 = vpack.c.bf16 %v150_v1, %v149_v0  ;;  %v152_v4 = vld [vmem:[#allocation5 + $0x18] sm:$0xff]  ;;  %v153_v6 = vld [vmem:[#allocation5 + $0x20] sm:$0xff]  ;;  %s584_s20 = sshll.u32 %s1229_s8, 4  ;;  %s585_s20 = int_to_ptr.vmem [resolvable:$true] %s584_s20 }
  0xa5   :  { %v826_v5 = vpack.c.bf16 %v152_v4, %v151_v2  ;;  %v154_v7 = vld [vmem:[#allocation5 + $0x28] sm:$0xff]  ;;  %v155_v9 = vld [vmem:[#allocation5 + $0x30] sm:$0xff]  ;;  %v156_v11 = vld [vmem:[#allocation5 + $0x38] sm:$0xff]  ;;  %s1184_s28 = scalar_lea.vmem %s585_s20, 256  ;;  %p1189_p3 = scmp.lt.s32.totalorder %s585_s20, %s585_s20 }
  0xa6   :  { %823 = vmatprep.subr.bf16.mxu0 %v822_v3  ;;  %v830_v8 = vpack.c.bf16 %v154_v7, %v153_v6  ;;  %v147_v10 = vld [vmem:[#allocation2] sm:$0xff]  ;;  %v259_v12 = vld [vmem:[#allocation8] sm:$0xff]  ;;  %v834_v15 = vpack.c.bf16 %v156_v11, %v155_v9  ;;  %v160_v20 = vld [vmem:[#allocation5 + $0x58] sm:$0xff]  ;;  %p1185_p2 = scmp.ne.s32.totalorder %s585_s20, %s1184_s28  ;;  %p1190_p4 = scmp.lt.s32.totalorder %s1184_s28, %s1184_s28 }
  0xa7   :  { %825 = vmatpush3.bf16.msra.mxu0 %v822_v3  ;;  %714 = vmatprep.mubr.f32.mxu0 %v147_v10  ;;  %v260_v13 = vld [vmem:[#allocation8 + $0x8] sm:$0xff]  ;;  %v157_v16 = vld [vmem:[#allocation5 + $0x40] sm:$0xff]  ;;  %v164_v26 = vld [vmem:[#allocation5 + $0x78] sm:$0xff] }
  0xa8   :  { %827 = vmatprep.subr.bf16.mxu0 %v826_v5  ;;  %v854_v14 = vpack.c.bf16 %v260_v13, %v259_v12  ;;  %v158_v17 = vld [vmem:[#allocation5 + $0x48] sm:$0xff]  ;;  %v159_v19 = vld [vmem:[#allocation5 + $0x50] sm:$0xff]  ;;  %v161_v22 = vld [vmem:[#allocation5 + $0x60] sm:$0xff]  ;;  %p1191_p5 = por %p1190_p4, %p1189_p3 }
  0xa9   :  { %v838_v18 = vpack.c.bf16 %v158_v17, %v157_v16  ;;  %v842_v21 = vpack.c.bf16 %v160_v20, %v159_v19  ;;  %v162_v23 = vld [vmem:[#allocation5 + $0x68] sm:$0xff]  ;;  %v163_v25 = vld [vmem:[#allocation5 + $0x70] sm:$0xff]  ;;  %v148_v28 = vld [vmem:[#allocation2 + $0x8] sm:$0xff] }
  0xaa   :  { %855 = vmatprep.subr.bf16.mxu1 %v854_v14  ;;  %v846_v24 = vpack.c.bf16 %v162_v23, %v161_v22  ;;  %v850_v27 = vpack.c.bf16 %v164_v26, %v163_v25  ;;  %v261_v29 = vld [vmem:[#allocation8 + $0x10] sm:$0xff]  ;;  %v262_v30 = vld [vmem:[#allocation8 + $0x18] sm:$0xff]  ;;  %v263_v32 = vld [vmem:[#allocation8 + $0x20] sm:$0xff]  ;;  %p1192_p6 = pnand %p1191_p5, %p1185_p2 }
  0xab   :  { %829 = vmatpush3.bf16.msra.mxu0 %v826_v5  ;;  %857 = vmatpush3.bf16.msra.mxu1 %v854_v14  ;;  %v858_v31 = vpack.c.bf16 %v262_v30, %v261_v29  ;;  %v264_v33 = vld [vmem:[#allocation8 + $0x28] sm:$0xff]  ;;  %v265_v35 = vld [vmem:[#allocation8 + $0x30] sm:$0xff]  ;;  %v266_v36 = vld [vmem:[#allocation8 + $0x38] sm:$0xff] }
  0xac   :  { %831 = vmatprep.subr.bf16.mxu0 %v830_v8  ;;  %v862_v34 = vpack.c.bf16 %v264_v33, %v263_v32  ;;  %v866_v37 = vpack.c.bf16 %v266_v36, %v265_v35  ;;  %v267_v38 = vld [vmem:[#allocation8 + $0x40] sm:$0xff]  ;;  %v268_v39 = vld [vmem:[#allocation8 + $0x48] sm:$0xff]  ;;  %v269_v41 = vld [vmem:[#allocation8 + $0x50] sm:$0xff] }
  0xad   :  { %859 = vmatprep.subr.bf16.mxu1 %v858_v31  ;;  %v870_v40 = vpack.c.bf16 %v268_v39, %v267_v38  ;;  %v270_v42 = vld [vmem:[#allocation8 + $0x58] sm:$0xff]  ;;  %v271_v44 = vld [vmem:[#allocation8 + $0x60] sm:$0xff]  ;;  %v272_v45 = vld [vmem:[#allocation8 + $0x68] sm:$0xff] }
  0xae   :  { %v874_v43 = vpack.c.bf16 %v270_v42, %v269_v41  ;;  %v273_v46 = vld [vmem:[#allocation8 + $0x70] sm:$0xff]  ;;  %v878_v47 = vpack.c.bf16 %v272_v45, %v271_v44  ;;  %v274_v48 = vld [vmem:[#allocation8 + $0x78] sm:$0xff]  ;;  %v369_v50 = vld [vmem:[#allocation11] sm:$0xff] }
  0xaf   :  { %833 = vmatpush3.bf16.msra.mxu0 %v830_v8  ;;  %861 = vmatpush3.bf16.msra.mxu1 %v858_v31  ;;  %v882_v49 = vpack.c.bf16 %v274_v48, %v273_v46  ;;  %v370_v51 = vld [vmem:[#allocation11 + $0x8] sm:$0xff]  ;;  %v600_v53 = vld [vmem:[#allocation7] ss:$0 sm:$0xff]  ;;  %v371_v2 = vld [vmem:[#allocation11 + $0x10] sm:$0xff] }
  0xb0   :  { %835 = vmatprep.subr.bf16.mxu0 %v834_v15  ;;  %863 = vmatprep.subr.bf16.mxu1 %v862_v34  ;;  %v886_v52 = vpack.c.bf16 %v370_v51, %v369_v50  ;;  %v372_v3 = vld [vmem:[#allocation11 + $0x18] sm:$0xff]  ;;  %v373_v5 = vld [vmem:[#allocation11 + $0x20] sm:$0xff]  ;;  %v374_v6 = vld [vmem:[#allocation11 + $0x28] sm:$0xff] }
  0xb1   :  { %v890_v4 = vpack.c.bf16 %v372_v3, %v371_v2  ;;  %v894_v7 = vpack.c.bf16 %v374_v6, %v373_v5  ;;  %v375_v8 = vld [vmem:[#allocation11 + $0x30] sm:$0xff]  ;;  %v376_v9 = vld [vmem:[#allocation11 + $0x38] sm:$0xff]  ;;  %v377_v11 = vld [vmem:[#allocation11 + $0x40] sm:$0xff] }
  0xb2   :  { %v898_v10 = vpack.c.bf16 %v376_v9, %v375_v8  ;;  %v378_v12 = vld [vmem:[#allocation11 + $0x48] sm:$0xff]  ;;  %v379_v14 = vld [vmem:[#allocation11 + $0x50] sm:$0xff]  ;;  %v381_v17 = vld [vmem:[#allocation11 + $0x60] sm:$0xff] }
  0xb3   :  { %837 = vmatpush3.bf16.msra.mxu0 %v834_v15  ;;  %865 = vmatpush3.bf16.msra.mxu1 %v862_v34  ;;  %v902_v13 = vpack.c.bf16 %v378_v12, %v377_v11  ;;  %v380_v15 = vld [vmem:[#allocation11 + $0x58] sm:$0xff]  ;;  %v383_v19 = vld [vmem:[#allocation11 + $0x70] sm:$0xff]  ;;  %v479_v23 = vld [vmem:[#allocation14] sm:$0xff] }
  0xb4   :  { %839 = vmatprep.subr.bf16.mxu0 %v838_v18  ;;  %867 = vmatprep.subr.bf16.mxu1 %v866_v37  ;;  %v906_v16 = vpack.c.bf16 %v380_v15, %v379_v14  ;;  %v603_v26 = vld [vmem:[#allocation10] ss:$0 sm:$0xff]  ;;  %v481_v39 = vld [vmem:[#allocation14 + $0x10] sm:$0xff]  ;;  %v483_v42 = vld [vmem:[#allocation14 + $0x20] sm:$0xff] }
  0xb5   :  { %v485_v45 = vld [vmem:[#allocation14 + $0x30] sm:$0xff]  ;;  %v486_v46 = vld [vmem:[#allocation14 + $0x38] sm:$0xff]  ;;  %v487_v48 = vld [vmem:[#allocation14 + $0x40] sm:$0xff] }
  0xb6   :  { %v489_v51 = vld [vmem:[#allocation14 + $0x50] sm:$0xff]  ;;  %v609_v9 = vld [vmem:[#allocation16] ss:$0 sm:$0xff] }
  0xb7   :  { %841 = vmatpush3.bf16.msra.mxu0 %v838_v18  ;;  %869 = vmatpush3.bf16.msra.mxu1 %v866_v37  ;;  %v382_v18 = vld [vmem:[#allocation11 + $0x68] sm:$0xff] }
  0xb8   :  { %843 = vmatprep.subr.bf16.mxu0 %v842_v21  ;;  %871 = vmatprep.subr.bf16.mxu1 %v870_v40  ;;  %v910_v20 = vpack.c.bf16 %v382_v18, %v381_v17 }
  0xbb   :  { %845 = vmatpush3.bf16.msra.mxu0 %v842_v21  ;;  %873 = vmatpush3.bf16.msra.mxu1 %v870_v40  ;;  %v384_v21 = vld [vmem:[#allocation11 + $0x78] sm:$0xff] }
  0xbc   :  { %847 = vmatprep.subr.bf16.mxu0 %v846_v24  ;;  %875 = vmatprep.subr.bf16.mxu1 %v874_v43  ;;  %v914_v22 = vpack.c.bf16 %v384_v21, %v383_v19  ;;  %v482_v40 = vld [vmem:[#allocation14 + $0x18] sm:$0xff] }
  0xbd   :  { %v922_v41 = vpack.c.bf16 %v482_v40, %v481_v39 }
  0xbf   :  { %849 = vmatpush3.bf16.msra.mxu0 %v846_v24  ;;  %877 = vmatpush3.bf16.msra.mxu1 %v874_v43  ;;  %v480_v24 = vld [vmem:[#allocation14 + $0x8] sm:$0xff] }
  0xc0   :  { %851 = vmatprep.subr.bf16.mxu0 %v850_v27  ;;  %879 = vmatprep.subr.bf16.mxu1 %v878_v47  ;;  %v918_v25 = vpack.c.bf16 %v480_v24, %v479_v23  ;;  %v484_v43 = vld [vmem:[#allocation14 + $0x28] sm:$0xff] }
  0xc1   :  { %v926_v44 = vpack.c.bf16 %v484_v43, %v483_v42 }
  0xc3   :  { %853 = vmatpush3.bf16.msra.mxu0 %v850_v27  ;;  %881 = vmatpush3.bf16.msra.mxu1 %v878_v47  ;;  %v930_v47 = vpack.c.bf16 %v486_v46, %v485_v45 }
  0xc4   :  { %883 = vmatprep.subr.bf16.mxu1 %v882_v49  ;;  %887 = vmatprep.subr.bf16.mxu0 %v886_v52 }
  0xc6   :  { %715 = vmatmul.mubr.f32.vlgmr.msra.gmra.mrb[0].mxu0 %v148_v28 }
  0xc7   :  { %885 = vmatpush3.bf16.msra.mxu1 %v882_v49  ;;  %889 = vmatpush3.bf16.msra.mxu0 %v886_v52  ;;  %v488_v49 = vld [vmem:[#allocation14 + $0x48] sm:$0xff]  ;;  %v490_v52 = vld [vmem:[#allocation14 + $0x58] sm:$0xff] }
  0xc8   :  { %891 = vmatprep.subr.bf16.mxu0 %v890_v4  ;;  %919 = vmatprep.subr.bf16.mxu1 %v918_v25  ;;  %v934_v50 = vpack.c.bf16 %v488_v49, %v487_v48 }
  0xcb   :  { %893 = vmatpush3.bf16.msra.mxu0 %v890_v4 }
  0xcc   :  { %895 = vmatprep.subr.bf16.mxu0 %v894_v7 }
  0xcf   :  { %897 = vmatpush3.bf16.msra.mxu0 %v894_v7 }
  0xd0   :  { %899 = vmatprep.subr.bf16.mxu0 %v898_v10 }
  0xd3   :  { %901 = vmatpush3.bf16.msra.mxu0 %v898_v10 }
  0xd4   :  { %903 = vmatprep.subr.bf16.mxu0 %v902_v13 }
  0xd7   :  { %905 = vmatpush3.bf16.msra.mxu0 %v902_v13 }
  0xd8   :  { %907 = vmatprep.subr.bf16.mxu0 %v906_v16 }
  0xdb   :  { %909 = vmatpush3.bf16.msra.mxu0 %v906_v16 }
  0xdc   :  { %911 = vmatprep.subr.bf16.mxu0 %v910_v20 }
  0xdf   :  { %913 = vmatpush3.bf16.msra.mxu0 %v910_v20 }
  0xe0   :  { %915 = vmatprep.subr.bf16.mxu0 %v914_v22 }
  0xe3   :  { %917 = vmatpush3.bf16.msra.mxu0 %v914_v22 }
 0x199   :  { %v716_v54 = vpop.f32.mrb[0].mxu0 }
 0x19a   :  { %v244_v55 = vadd.f32 %v716_v54, %v600_v53  ;;  %v238_v56 = vpop.f32.mrb[1].mxu0  ;;  %v491_v54 = vld [vmem:[#allocation14 + $0x60] sm:$0xff] }
 0x19b   :  { %v239_v57 = vadd.f32 %v600_v53, %v238_v56  ;;  %v938_v53 = vpack.c.bf16 %v490_v52, %v489_v51  ;;  %v493_v56 = vld [vmem:[#allocation14 + $0x70] sm:$0xff] }
 0x19c   :  { %v602_v58 = vmul.f32 -1.442695, %v244_v55  ;;  %v492_v55 = vld [vmem:[#allocation14 + $0x68] sm:$0xff] }
 0x19d   :  { %v601_v59 = vmul.f32 -1.442695, %v239_v57  ;;  %v942_v57 = vpack.c.bf16 %v492_v55, %v491_v54 }
 0x19e   :  { %962 = vpow2.f32 %v602_v58  ;;  %v494_v58 = vld [vmem:[#allocation14 + $0x78] sm:$0xff] }
 0x19f   :  { %964 = vpow2.f32 %v601_v59  ;;  %v946_v59 = vpack.c.bf16 %v494_v58, %v493_v56 }
 0x1a8   :  { %v963_v60 = vpop.eup %962 }
 0x1a9   :  { %v965_v61 = vpop.eup %964  ;;  %v254_v62 = vadd.f32 1.0, %v963_v60  ;;  %v606_v60 = vld [vmem:[#allocation13] ss:$0 sm:$0xff] }
 0x1aa   :  { %v253_v63 = vadd.f32 1.0, %v965_v61 }
 0x1ac   :  { %966 = vrcp.f32 %v253_v63 }
 0x1ad   :  { %968 = vrcp.f32 %v254_v62 }
 0x1b6   :  { %v967_v0 = vpop.eup %966 }
 0x1b7   :  { %v969_v1 = vpop.eup %968  ;;  %749 = vmatprep.mubr.f32.mxu1 %v967_v0 }
 0x1b8   :  { %750 = vmatmul.mubr.f32.vlgmr.msra.gmra.mrb[0].mxu1 %v969_v1 }
 0x1b9   :  { %921 = vmatpush3.bf16.msra.mxu1 %v918_v25 }
 0x1ba   :  { %923 = vmatprep.subr.bf16.mxu1 %v922_v41 }
 0x1bd   :  { %925 = vmatpush3.bf16.msra.mxu1 %v922_v41 }
 0x1be   :  { %927 = vmatprep.subr.bf16.mxu1 %v926_v44 }
 0x1c1   :  { %929 = vmatpush3.bf16.msra.mxu1 %v926_v44 }
 0x1c2   :  { %931 = vmatprep.subr.bf16.mxu1 %v930_v47 }
 0x1c5   :  { %933 = vmatpush3.bf16.msra.mxu1 %v930_v47 }
 0x1c6   :  { %935 = vmatprep.subr.bf16.mxu1 %v934_v50 }
 0x1c9   :  { %937 = vmatpush3.bf16.msra.mxu1 %v934_v50 }
 0x1ca   :  { %939 = vmatprep.subr.bf16.mxu1 %v938_v53 }
 0x1cd   :  { %941 = vmatpush3.bf16.msra.mxu1 %v938_v53 }
 0x1ce   :  { %943 = vmatprep.subr.bf16.mxu1 %v942_v57 }
 0x1d1   :  { %945 = vmatpush3.bf16.msra.mxu1 %v942_v57 }
 0x1d2   :  { %947 = vmatprep.subr.bf16.mxu1 %v946_v59 }
 0x1d5   :  { %949 = vmatpush3.bf16.msra.mxu1 %v946_v59 }
 0x28b   :  { %v751_v27 = vpop.f32.mrb[0].mxu1 }
 0x28c   :  { %v354_v28 = vadd.f32 %v751_v27, %v603_v26  ;;  %v348_v29 = vpop.f32.mrb[1].mxu1 }
 0x28d   :  { %v349_v30 = vadd.f32 %v603_v26, %v348_v29 }
 0x28e   :  { %v605_v31 = vmul.f32 -1.442695, %v354_v28 }
 0x28f   :  { %v604_v32 = vmul.f32 -1.442695, %v349_v30 }
 0x290   :  { %970 = vpow2.f32 %v605_v31 }
 0x291   :  { %972 = vpow2.f32 %v604_v32 }
 0x29a   :  { %v971_v33 = vpop.eup %970 }
 0x29b   :  { %v973_v34 = vpop.eup %972  ;;  %v364_v35 = vadd.f32 1.0, %v971_v33 }
 0x29c   :  { %v363_v36 = vadd.f32 1.0, %v973_v34 }
 0x29e   :  { %974 = vrcp.f32 %v363_v36 }
 0x29f   :  { %976 = vrcp.f32 %v364_v35 }
 0x2a8   :  { %v975_v37 = vpop.eup %974 }
 0x2a9   :  { %v977_v38 = vpop.eup %976  ;;  %784 = vmatprep.mubr.f32.mxu0 %v975_v37 }
 0x2aa   :  { %785 = vmatmul.mubr.f32.vlgmr.msra.gmra.mrb[2].mxu0 %v977_v38 }
 0x37d   :  { %v786_v61 = vpop.f32.mrb[2].mxu0 }
 0x37e   :  { %v464_v62 = vadd.f32 %v786_v61, %v606_v60  ;;  %v458_v63 = vpop.f32.mrb[3].mxu0 }
 0x37f   :  { %v459_v0 = vadd.f32 %v606_v60, %v458_v63 }
 0x380   :  { %v608_v1 = vmul.f32 -1.442695, %v464_v62 }
 0x381   :  { %v607_v2 = vmul.f32 -1.442695, %v459_v0 }
 0x382   :  { %978 = vpow2.f32 %v608_v1 }
 0x383   :  { %980 = vpow2.f32 %v607_v2 }
 0x38c   :  { %v979_v3 = vpop.eup %978 }
 0x38d   :  { %v981_v4 = vpop.eup %980  ;;  %v474_v5 = vadd.f32 1.0, %v979_v3 }
 0x38e   :  { %v473_v6 = vadd.f32 1.0, %v981_v4 }
 0x390   :  { %982 = vrcp.f32 %v473_v6 }
 0x391   :  { %984 = vrcp.f32 %v474_v5 }
 0x39a   :  { %v983_v7 = vpop.eup %982 }
 0x39b   :  { %v985_v8 = vpop.eup %984  ;;  %819 = vmatprep.mubr.f32.mxu1 %v983_v7 }
 0x39c   :  { %820 = vmatmul.mubr.f32.vlgmr.msra.gmra.mrb[2].mxu1 %v985_v8 }
 0x46f   :  { %v821_v10 = vpop.f32.mrb[2].mxu1 }
 0x470   :  { %v574_v11 = vadd.f32 %v821_v10, %v609_v9  ;;  %v568_v12 = vpop.f32.mrb[3].mxu1 }
 0x471   :  { %v569_v13 = vadd.f32 %v609_v9, %v568_v12 }
 0x472   :  { %578 = vst [vmem:[#allocation17 + $0x8] sm:$0xff] %v574_v11 }
 0x473   :  { %577 = vst [vmem:[#allocation17] sm:$0xff] %v569_v13 }
 0x474   :  { %1195 = shalt.err (!%p1192_p6)
}
 0x475   :  { %s1196_s11 = scalar_lea.hbm %s1441_s9, 256 }
 0x476   :  { %p1197_p7 = scmp.ne.s32.totalorder %s1441_s9, %s1196_s11  ;;  %p1200_p8 = scmp.lt.u32.totalorder %s1196_s11, %s1441_s9 }
 0x478   :  { %p1202_p9 = pnand %p1200_p8, %p1197_p7 }
 0x47a   :  { %1205 = shalt.err (!%p1202_p9)
}
 0x47b   :  { %590 = dma.vmem_to_hbm [thread:$0]  %s585_s20, 256, %s1441_s9, [#allocation4], %s1220_s21, %s1220_s21, %s1221_s22  }
 0x47c   :  { %1216 = dma.done.wait [#allocation4], 256  }
 0x47d   :  { %1217 = vsyncadd [#allocation4], 4294967040 }
 0x47e   :  { %594 = vsyncpa [#allocation3], 1 }
 0x47f   :  { %595 = vsyncpa [#allocation6], 1 }
 0x480   :  { %596 = vsyncpa [#allocation9], 1 }
 0x481   :  { %597 = vsyncpa [#allocation12], 1 }
 0x482   :  { %598 = vsyncpa [#allocation15], 1 }
 0x483   :  { %599 = vsyncpa [#allocation4], 1 }

</bundles_post_ra>
